<compile_context>
chip_gen: v5e
topology: v5e:2x2
jax: 0.10.0
libtpu: 0.0.40
codegen_flags: <defaults>
</compile_context>

<pallas_src>
import numpy as np
import jax
import jax.numpy as jnp
from jax.experimental import pallas as pl
from jax.experimental.pallas import tpu as pltpu

# ----------------------------- configuration --------------------------------
B = 2
L = 8
D_EMB_1 = 32
D_EMB_2 = 48
FBP_HID = 32
FBP_K = 2
NORM_EPS = 1e-12          # F.normalize default eps


# ------------------------------- kernel --------------------------------------
def fbp_kernel(x_ref, w_ref, pool_ref, out_ref):
    # x_ref    : (M, d1+d2)        rows are [seq1_row | seq2_row]
    # w_ref    : (d1+d2, 2*hid*k)  block-diagonal [[f1, 0], [0, f2]]
    # pool_ref : (hid*k, hid)      0/1 adjacent-group-sum matrix (AvgPool1d(k)*k)
    # out_ref  : (M, hid)
    x = x_ref[...]
    proj = jnp.dot(x, w_ref[...], preferred_element_type=jnp.float32)   # (M, 2*hid*k)

    hk = pool_ref.shape[0]
    s1 = proj[:, :hk]                                                   # seq1 projection
    s2 = proj[:, hk:]                                                   # seq2 projection
    fused = s1 * s2                                                     # dropout == identity

    pooled = jnp.dot(fused, pool_ref[...],
                     preferred_element_type=jnp.float32)                # (M, hid)

    # F.normalize(p=2, dim=-1, eps=1e-12)  ==  x / max(||x||, eps)
    sumsq = jnp.sum(pooled * pooled, axis=-1, keepdims=True)
    inv = jax.lax.rsqrt(jnp.maximum(sumsq, NORM_EPS * NORM_EPS))
    out_ref[...] = (pooled * inv).astype(out_ref.dtype)


# ------------------------------- wrapper --------------------------------------
@jax.jit
def fbp_forward(seq1, seq2, w, pool):
    lead = seq1.shape[:-1]
    d1 = seq1.shape[-1]
    d2 = seq2.shape[-1]
    M = int(np.prod(lead))
    hk, hid = pool.shape

    # Collapse batch into the matmul M dimension and merge the two inputs so the
    # kernel does one wide projection.
    x = jnp.concatenate([seq1.reshape(M, d1), seq2.reshape(M, d2)], axis=-1)

    out = pl.pallas_call(
        fbp_kernel,
        out_shape=jax.ShapeDtypeStruct((M, hid), jnp.float32),
        grid=(1,),
        in_specs=[
            pl.BlockSpec((M, d1 + d2), lambda i: (0, 0)),
            pl.BlockSpec((d1 + d2, 2 * hk), lambda i: (0, 0)),
            pl.BlockSpec((hk, hid), lambda i: (0, 0)),
        ],
        out_specs=pl.BlockSpec((M, hid), lambda i: (0, 0)),
        compiler_params=pltpu.CompilerParams(dimension_semantics=("arbitrary",)),
    )(x, w, pool)
    return out.reshape(*lead, hid)


# ----------------------------- parameters -------------------------------------
def build_params(key):
    k1, k2 = jax.random.split(key)
    bound1 = 1.0 / np.sqrt(D_EMB_1)
    bound2 = 1.0 / np.sqrt(D_EMB_2)
    # (fan_in, fan_out) layout; matches PyTorch nn.Linear default init bounds.
    f1 = jax.random.uniform(k1, (D_EMB_1, FBP_HID * FBP_K), jnp.float32, -bound1, bound1)
    f2 = jax.random.uniform(k2, (D_EMB_2, FBP_HID * FBP_K), jnp.float32, -bound2, bound2)

    hk = FBP_HID * FBP_K
    # Merged block-diagonal projection: [x1 | x2] @ W == [x1 @ f1 | x2 @ f2]
    w = jnp.zeros((D_EMB_1 + D_EMB_2, 2 * hk), jnp.float32)
    w = w.at[:D_EMB_1, :hk].set(f1)
    w = w.at[D_EMB_1:, hk:].set(f2)

    # AvgPool1d(kernel=k, stride=k, no padding) followed by "* k" == sum over
    # adjacent groups of k, realised host-side as a 0/1 matrix.
    pool = np.zeros((hk, FBP_HID), np.float32)
    pool[np.arange(hk), np.arange(hk) // FBP_K] = 1.0

    return {"w": w, "pool": jnp.asarray(pool), "f1": f1, "f2": f2}


# ------------------------------- reference ------------------------------------
def fbp_reference(seq1, seq2, f1, f2):
    s1 = seq1 @ f1
    s2 = seq2 @ f2
    fused = s1 * s2
    pooled = fused.reshape(*fused.shape[:-1], FBP_HID, FBP_K).sum(-1)
    nrm = jnp.sqrt(jnp.sum(pooled * pooled, axis=-1, keepdims=True))
    return pooled / jnp.maximum(nrm, NORM_EPS)


# --------------------------------- main ----------------------------------------
if __name__ == "__main__":
    root = jax.random.PRNGKey(0)
    k_in1, k_in2, k_params = jax.random.split(root, 3)
    seq1 = jax.random.normal(k_in1, (B, L, D_EMB_1), jnp.float32)
    seq2 = jax.random.normal(k_in2, (B, L, D_EMB_2), jnp.float32)

    params = build_params(k_params)

    out = fbp_forward(seq1, seq2, params["w"], params["pool"])
    jax.block_until_ready(out)
    assert out.shape == (B, L, FBP_HID)

    ref = fbp_reference(seq1, seq2, params["f1"], params["f2"])
    assert jnp.allclose(out, ref, atol=1e-4, rtol=1e-4)

    print("KERNEL_OK")
</pallas_src>

<mosaic_0001>
module attributes {stable_mosaic.version = 11 : i64} {
  func.func @fbp_kernel(%arg0: i32, %arg1: memref<16x80xf32, #tpu.memory_space<vmem>>, %arg2: memref<80x128xf32, #tpu.memory_space<vmem>>, %arg3: memref<64x32xf32, #tpu.memory_space<vmem>>, %arg4: memref<16x32xf32, #tpu.memory_space<vmem>>) attributes {dimension_semantics = [#tpu.dimension_semantics<arbitrary>], iteration_bounds = array<i64: 1>, scalar_prefetch = 0 : i64, scratch_operands = 0 : i64, tpu.core_type = #tpu.core_type<tc>, window_params = [{pipeline_mode = #tpu.pipeline_mode<synchronous>, transform_indices = @transform_0, window_bounds = array<i64: 16, 80>}, {pipeline_mode = #tpu.pipeline_mode<synchronous>, transform_indices = @transform_1, window_bounds = array<i64: 80, 128>}, {pipeline_mode = #tpu.pipeline_mode<synchronous>, transform_indices = @transform_2, window_bounds = array<i64: 64, 32>}, {pipeline_mode = #tpu.pipeline_mode<synchronous>, transform_indices = @transform_3, window_bounds = array<i64: 16, 32>}]} {
    %c0 = arith.constant 0 : index
    %c0_0 = arith.constant 0 : index
    %0 = vector.load %arg1[%c0, %c0_0] : memref<16x80xf32, #tpu.memory_space<vmem>>, vector<16x80xf32>
    %c0_1 = arith.constant 0 : index
    %c0_2 = arith.constant 0 : index
    %1 = vector.load %arg2[%c0_1, %c0_2] : memref<80x128xf32, #tpu.memory_space<vmem>>, vector<80x128xf32>
    %cst = arith.constant dense<0.000000e+00> : vector<16x128xf32>
    %2 = tpu.matmul %0, %1, %cst {dimension_numbers = #tpu.dot_dimension_numbers<[1], [0], [0], [1], [0, 0, 1, 1], [], []>} : vector<16x80xf32>, vector<80x128xf32>, vector<16x128xf32> -> vector<16x128xf32>
    %3 = vector.extract_strided_slice %2 {offsets = [0, 0], sizes = [16, 64], strides = [1, 1]} : vector<16x128xf32> to vector<16x64xf32>
    %4 = vector.extract_strided_slice %2 {offsets = [0, 64], sizes = [16, 64], strides = [1, 1]} : vector<16x128xf32> to vector<16x64xf32>
    %5 = arith.mulf %3, %4 : vector<16x64xf32>
    %c0_3 = arith.constant 0 : index
    %c0_4 = arith.constant 0 : index
    %6 = vector.load %arg3[%c0_3, %c0_4] : memref<64x32xf32, #tpu.memory_space<vmem>>, vector<64x32xf32>
    %cst_5 = arith.constant dense<0.000000e+00> : vector<16x32xf32>
    %7 = tpu.matmul %5, %6, %cst_5 {dimension_numbers = #tpu.dot_dimension_numbers<[1], [0], [0], [1], [0, 0, 1, 1], [], []>} : vector<16x64xf32>, vector<64x32xf32>, vector<16x32xf32> -> vector<16x32xf32>
    %8 = arith.mulf %7, %7 : vector<16x32xf32>
    %cst_6 = arith.constant dense<0.000000e+00> : vector<16xf32>
    %9 = vector.multi_reduction <add>, %8, %cst_6 [1] : vector<16x32xf32> to vector<16xf32>
    %10 = vector.shape_cast %9 : vector<16xf32> to vector<16x1xf32>
    %cst_7 = arith.constant 1.000000e-24 : f32
    %11 = vector.broadcast %cst_7 : f32 to vector<16x1xf32>
    %12 = arith.maximumf %10, %11 : vector<16x1xf32>
    %13 = math.rsqrt %12 : vector<16x1xf32>
    %14 = vector.broadcast %13 : vector<16x1xf32> to vector<16x32xf32>
    %15 = arith.mulf %7, %14 : vector<16x32xf32>
    %c0_8 = arith.constant 0 : index
    %c0_9 = arith.constant 0 : index
    %16 = vector.load %arg4[%c0_8, %c0_9] : memref<16x32xf32, #tpu.memory_space<vmem>>, vector<16x32xf32>
    tpu.vector_store %arg4[%c0_8, %c0_9], %15 {strides = array<i32>} : memref<16x32xf32, #tpu.memory_space<vmem>>, vector<16x32xf32>,
    return
  }
  func.func @transform_0(%arg0: i32) -> (i32, i32) {
    %c0_i32 = arith.constant 0 : i32
    %c0_i32_0 = arith.constant 0 : i32
    %c0_i32_1 = arith.constant 0 : i32
    return %c0_i32, %c0_i32_0 : i32, i32
  }
  func.func @transform_1(%arg0: i32) -> (i32, i32) {
    %c0_i32 = arith.constant 0 : i32
    %c0_i32_0 = arith.constant 0 : i32
    %c0_i32_1 = arith.constant 0 : i32
    return %c0_i32, %c0_i32_0 : i32, i32
  }
  func.func @transform_2(%arg0: i32) -> (i32, i32) {
    %c0_i32 = arith.constant 0 : i32
    %c0_i32_0 = arith.constant 0 : i32
    %c0_i32_1 = arith.constant 0 : i32
    return %c0_i32, %c0_i32_0 : i32, i32
  }
  func.func @transform_3(%arg0: i32) -> (i32, i32) {
    %c0_i32 = arith.constant 0 : i32
    %c0_i32_0 = arith.constant 0 : i32
    %c0_i32_1 = arith.constant 0 : i32
    return %c0_i32, %c0_i32_0 : i32, i32
  }
}

</mosaic_0001>

<bundles_post_ra>
// kernel: fbp_forward.1
= control target key start
LH: loop header
LB: loop body
LE: loop exit
PB: predicated region body
PF: predicated region fallthrough
CT: control target
= control target key end

     0   :  { %s305_s0 = inlined_call_operand.vmem [shape: f32[16,80], index: 0, kind: input, shape index: {}]   ;;  %s306_s1 = inlined_call_operand.vmem [shape: f32[80,128], index: 1, kind: input, shape index: {}]   ;;  %s307_s2 = inlined_call_operand.vmem [shape: f32[64,32], index: 2, kind: input, shape index: {}]   ;;  %s308_s3 = inlined_call_operand.hbm [shape: f32[16,32], index: 3, kind: output, shape index: {}]  }
   0x1   :  { %v26_v0 = vld [vmem:[%s306_s1 + $0x48] sm:$0xff]  ;;  %v25_v1 = vld [vmem:[%s306_s1 + $0x40] sm:$0xff]  ;;  %v24_v2 = vld [vmem:[%s306_s1 + $0x38] sm:$0xff] }
   0x2   :  { %162 = vmatpush.msra.mxu2 %v26_v0  ;;  %40 = vmatpush.msra.mxu0 %v26_v0  ;;  %v23_v3 = vld [vmem:[%s306_s1 + $0x30] sm:$0xff] }
   0x4   :  { %163 = vmatpush.msra.mxu2 %v25_v1  ;;  %41 = vmatpush.msra.mxu0 %v25_v1 }
   0x5   :  { %8 = vsyncpa [#allocation3], 0  ;;  %v22_v4 = vld [vmem:[%s306_s1 + $0x28] sm:$0xff]  ;;  %v21_v5 = vld [vmem:[%s306_s1 + $0x20] sm:$0xff]  ;;  %vm27_vm0 = vcmask 654336   ;;  %s214_s21 = smov 64  }
   0x6   :  { %164 = vmatpush.msra.mxu2 %v24_v2  ;;  %42 = vmatpush.msra.mxu0 %v24_v2  ;;  %v20_v6 = vld [vmem:[%s306_s1 + $0x18] sm:$0xff]  ;;  %v19_v7 = vld [vmem:[%s306_s1 + $0x10] sm:$0xff]  ;;  %v18_v8 = vld [vmem:[%s306_s1 + $0x8] sm:$0xff]  ;;  %vm75_vm1 = vcmask 523264   ;;  %vm107_vm2 = vcmask 261120   ;;  %s146_s27 = sshll.u32 %s308_s3, 4  ;;  %s147_s27 = int_to_ptr.hbm [resolvable:$true] %s146_s27 }
   0x7   :  { %v17_v9 = vld [vmem:[%s306_s1] sm:$0xff]  ;;  %v16_v10 = vld [vmem:[%s305_s0 + $0x8] sm:$0xff]  ;;  %v74_v12 = vld [vmem:[%s307_s2 + $0x38] sm:$0xff]  ;;  %s216_s28 = smov 128   ;;  %s217_s29 = smov 8  }
   0x8   :  { %165 = vmatpush.msra.mxu2 %v23_v3  ;;  %43 = vmatpush.msra.mxu0 %v23_v3  ;;  %v15_v11 = vld [vmem:[%s305_s0] sm:$0xff]  ;;  %v73_v13 = vld [vmem:[%s307_s2 + $0x30] sm:$0xff]  ;;  %v72_v14 = vld [vmem:[%s307_s2 + $0x28] sm:$0xff] }
   0x9   :  { %172 = vmatpush.msra.mxu3 %v74_v12  ;;  %90 = vmatpush.msra.mxu1 %v74_v12  ;;  %v71_v15 = vld [vmem:[%s307_s2 + $0x20] sm:$0xff]  ;;  %v70_v16 = vld [vmem:[%s307_s2 + $0x18] sm:$0xff]  ;;  %v69_v17 = vld [vmem:[%s307_s2 + $0x10] sm:$0xff] }
   0xa   :  { %166 = vmatpush.msra.mxu2 %v22_v4  ;;  %44 = vmatpush.msra.mxu0 %v22_v4  ;;  %v68_v18 = vld [vmem:[%s307_s2 + $0x8] sm:$0xff]  ;;  %v67_v21 = vld [vmem:[%s307_s2] sm:$0xff]  ;;  %s215_s2 = smov [#allocation2]  }
   0xb   :  { %173 = vmatpush.msra.mxu3 %v73_v13  ;;  %91 = vmatpush.msra.mxu1 %v73_v13  ;;  %s144_s24 = sshll.u32 %s215_s2, 4  ;;  %s145_s24 = int_to_ptr.vmem [resolvable:$true] %s144_s24 }
   0xc   :  { %167 = vmatpush.msra.mxu2 %v21_v5  ;;  %45 = vmatpush.msra.mxu0 %v21_v5 }
   0xd   :  { %174 = vmatpush.msra.mxu3 %v72_v14  ;;  %92 = vmatpush.msra.mxu1 %v72_v14 }
   0xe   :  { %168 = vmatpush.msra.mxu2 %v20_v6  ;;  %46 = vmatpush.msra.mxu0 %v20_v6 }
   0xf   :  { %175 = vmatpush.msra.mxu3 %v71_v15  ;;  %93 = vmatpush.msra.mxu1 %v71_v15 }
  0x10   :  { %169 = vmatpush.msra.mxu2 %v19_v7  ;;  %47 = vmatpush.msra.mxu0 %v19_v7 }
  0x11   :  { %176 = vmatpush.msra.mxu3 %v70_v16  ;;  %94 = vmatpush.msra.mxu1 %v70_v16 }
  0x12   :  { %170 = vmatpush.msra.mxu2 %v18_v8  ;;  %48 = vmatpush.msra.mxu0 %v18_v8 }
  0x13   :  { %177 = vmatpush.msra.mxu3 %v69_v17  ;;  %95 = vmatpush.msra.mxu1 %v69_v17 }
  0x14   :  { %171 = vmatpush.msra.mxu2 %v17_v9  ;;  %49 = vmatpush.msra.mxu0 %v17_v9 }
  0x15   :  { %159 = vmatmul.msk.f32.vlgmr.msra.gmra.mxu2 %vm27_vm0, %v16_v10  ;;  %158 = vmatmul.msk.f32.vlgmr.msra.gmra.mxu0 %vm27_vm0, %v15_v11 }
  0x16   :  { %178 = vmatpush.msra.mxu3 %v68_v18  ;;  %96 = vmatpush.msra.mxu1 %v68_v18 }
  0x18   :  { %179 = vmatpush.msra.mxu3 %v67_v21  ;;  %97 = vmatpush.msra.mxu1 %v67_v21 }
  0x92   :  { %v51_v20 = vpop.f32.mrf.mxu0 }
  0x98   :  { %v54_v19 = vpop.f32.mrf.mxu2 }
  0x99   :  { %61 = vrot.lane.b32.xlu0 %v54_v19, %s214_s21 }
  0xa1   :  { %59 = vrot.lane.b32.xlu0 %v51_v20, %s214_s21 }
 0x10b   :  { %v62_v22 = vpop.permute.xlu0 %61 }
 0x10c   :  { %v66_v23 = vmul.f32 %v62_v22, %v54_v19 }
 0x10e   :  { %161 = vmatmul.msk.f32.vlgmr.msra.gmra.mxu3 %vm75_vm1, %v66_v23 }
 0x113   :  { %v60_v24 = vpop.permute.xlu0 %59 }
 0x114   :  { %v65_v25 = vmul.f32 %v60_v24, %v51_v20 }
 0x116   :  { %160 = vmatmul.msk.f32.vlgmr.msra.gmra.mxu1 %vm75_vm1, %v65_v25 }
 0x191   :  { %v102_v29 = vpop.f32.mrf.mxu3 }
 0x192   :  { %v106_v30 = vmul.f32 %v102_v29, %v102_v29 }
 0x193   :  { %v99_v26 = vpop.f32.mrf.mxu1 }
 0x194   :  { %v105_v27 = vmul.f32 %v99_v26, %v99_v26  ;;  %v111_v31 = vsel %vm107_vm2, %v106_v30, 0.0 }
 0x196   :  { %v108_v28 = vsel %vm107_vm2, %v105_v27, 0.0 }
 0x197   :  { %109 = vadd.xlane.f32.xlu1 %v108_v28 }
 0x19f   :  { %112 = vadd.xlane.f32.xlu1 %v111_v31 }
 0x20a   :  { %v110_v32 = vpop.xlane.xlu1 %109 }
 0x20b   :  { %v114_v33 = vmax.f32 %v110_v32, 1e-24 }
 0x20d   :  { %184 = vrsqrt.f32 %v114_v33  ;;  %vm122_vm4 = vweird.f32 %v114_v33 }
 0x212   :  { %v113_v34 = vpop.xlane.xlu1 %112 }
 0x213   :  { %v185_v35 = vpop.eup %184  ;;  %v115_v36 = vmax.f32 %v113_v34, 1e-24 }
 0x214   :  { %v117_v37 = vmul.f32 %v185_v35, %v114_v33  ;;  %vm123_vm3 = vweird.f32 %v185_v35 }
 0x215   :  { %186 = vrsqrt.f32 %v115_v36  ;;  %vm124_vm5 = vmor %vm122_vm4, %vm123_vm3  ;;  %vm132_vm7 = vweird.f32 %v115_v36 }
 0x216   :  { %v118_v38 = vmul.f32 %v185_v35, %v117_v37 }
 0x218   :  { %v119_v39 = vmul.f32 0.5, %v118_v38 }
 0x21a   :  { %v120_v40 = vsub.f32 1.5, %v119_v39 }
 0x21b   :  { %v187_v41 = vpop.eup %186 }
 0x21c   :  { %v121_v42 = vmul.f32 %v185_v35, %v120_v40  ;;  %v127_v43 = vmul.f32 %v187_v41, %v115_v36  ;;  %vm133_vm6 = vweird.f32 %v187_v41 }
 0x21d   :  { %vm134_vm8 = vmor %vm132_vm7, %vm133_vm6 }
 0x21e   :  { %v125_v44 = vsel %vm124_vm5, %v185_v35, %v121_v42  ;;  %v128_v45 = vmul.f32 %v187_v41, %v127_v43 }
 0x21f   :  { %v136_v46 = vmul.f32 %v125_v44, %v99_v26 }
 0x220   :  { %v129_v47 = vmul.f32 0.5, %v128_v45 }
 0x221   :  { %138 = vst.msk [vmem:[#allocation2] sm:$0xff] %vm107_vm2, %v136_v46 }
 0x222   :  { %v130_v48 = vsub.f32 1.5, %v129_v47 }
 0x224   :  { %v131_v49 = vmul.f32 %v187_v41, %v130_v48 }
 0x226   :  { %v135_v50 = vsel %vm134_vm8, %v187_v41, %v131_v49 }
 0x227   :  { %v137_v51 = vmul.f32 %v135_v50, %v102_v29 }
 0x229   :  { %139 = vst.msk [vmem:[#allocation2 + $0x8] sm:$0xff] %vm107_vm2, %v137_v51 }
 0x22a   :  { %152 = dma.vmem_to_hbm [thread:$0]  %s145_s24, 256, %s147_s27, [#allocation3], %s216_s28, %s216_s28, %s217_s29  }
 0x22b   :  { %212 = dma.done.wait [#allocation3], 256  }
 0x22c   :  { %213 = vsyncadd [#allocation3], 4294967040 }
 0x22d   :  { %157 = vsyncpa [#allocation3], 1 }

</bundles_post_ra>
